<compile_context>
chip_gen: v7x
topology: tpu7x:2x2x1
jax: 0.10.0
libtpu: 0.0.40
codegen_flags: <defaults>
</compile_context>

<pallas_src>
import jax
import jax.numpy as jnp
from jax.experimental import pallas as pl
from jax.experimental.pallas import tpu as pltpu


def _round_up(x, m):
    return ((x + m - 1) // m) * m


def _proj_kernel(x_ref, w_ref, b_ref, o_ref):
    # x_ref: (TM, K), w_ref: (K, N_out), b_ref: (1, N_out) f32, o_ref: (TM, N_out)
    acc = jnp.dot(x_ref[...], w_ref[...], preferred_element_type=jnp.float32)
    o_ref[...] = (acc + b_ref[...]).astype(o_ref.dtype)


def _pick_tm(M, K, N_out, x_itemsize, w_itemsize, max_tm=1024,
             vmem_budget=24 * 1024 * 1024):
    """Largest multiple-of-32 row tile whose pipelined working set fits VMEM."""
    sub = 32  # safe sublane multiple for f32/bf16/int8
    tm = min(max_tm, _round_up(M, sub))
    tm = _round_up(tm, sub)
    while tm > sub:
        need = (2 * tm * K * x_itemsize            # double-buffered x tiles
                + (K * N_out + N_out) * w_itemsize  # resident weight + bias
                + 2 * tm * N_out * x_itemsize)      # double-buffered out tiles
        if need <= vmem_budget:
            break
        tm = _round_up(max(tm // 2, sub), sub)
    return max(tm, sub)


def downsample(x, weight, bias, pool=4, max_tm=1024):
    """x: (..., L, C); weight: (C*expand, C*pool) [PyTorch (out,in)]; bias: (C*expand,)."""
    *lead, L, C = x.shape
    assert L % pool == 0, "sequence length must be divisible by pool"
    Lp = L // pool
    K = C * pool                  # in features
    N = weight.shape[0]           # out features (C * expand)
    assert weight.shape == (N, K)
    assert bias.shape == (N,)

    # Same semantics as torch.reshape: fold `pool` consecutive timesteps into channels.
    x_r = x.reshape(*lead, Lp, K)
    M = Lp
    for d in lead:
        M *= d
    x_flat = x_r.reshape(M, K)

    # Lane-dense output only when the extra write traffic is modest (<= 2x).
    if N % 128 == 0:
        N_out = N
    else:
        n_pad = _round_up(N, 128)
        N_out = n_pad if n_pad <= 2 * N else N

    x_itemsize = jnp.dtype(x.dtype).itemsize
    w_itemsize = jnp.dtype(weight.dtype).itemsize
    TM = _pick_tm(M, K, N_out, x_itemsize, w_itemsize, max_tm=max_tm)
    M_pad = _round_up(M, TM)

    # One-time trace-level parameter prep (no per-tile work in the kernel).
    w_t = weight.T                                  # (K, N)
    b = bias.astype(jnp.float32)
    if N_out != N:
        w_t = jnp.pad(w_t, ((0, 0), (0, N_out - N)))
        b = jnp.pad(b, (0, N_out - N))
    b_2d = b.reshape(1, N_out)

    if M_pad != M:
        x_flat = jnp.pad(x_flat, ((0, M_pad - M), (0, 0)))

    grid_m = M_pad // TM
    cost = pl.CostEstimate(
        flops=2 * M_pad * K * N_out,
        transcendentals=0,
        bytes_accessed=(M_pad * K * x_itemsize
                        + (K * N_out + N_out) * w_itemsize
                        + M_pad * N_out * x_itemsize),
    )

    out_flat = pl.pallas_call(
        _proj_kernel,
        out_shape=jax.ShapeDtypeStruct((M_pad, N_out), x.dtype),
        grid_spec=pltpu.PrefetchScalarGridSpec(
            num_scalar_prefetch=0,
            grid=(grid_m,),
            in_specs=[
                pl.BlockSpec((TM, K), lambda i: (i, 0)),       # x tile (streamed)
                pl.BlockSpec((K, N_out), lambda i: (0, 0)),    # weight (resident)
                pl.BlockSpec((1, N_out), lambda i: (0, 0)),    # bias (resident)
            ],
            out_specs=pl.BlockSpec((TM, N_out), lambda i: (i, 0)),
        ),
        compiler_params=pltpu.CompilerParams(
            dimension_semantics=("parallel",)),
        cost_estimate=cost,
    )(x_flat, w_t, b_2d)

    out = out_flat[:M, :N]
    return out.reshape(*lead, Lp, N)


if __name__ == "__main__":
    # Small shapes consistent with the module: batch=2, seq=16, channels=4.
    B, L, C = 2, 16, 4
    pool, expand = 4, 2

    key = jax.random.PRNGKey(0)
    kx, kw, kb = jax.random.split(key, 3)

    x = jax.random.normal(kx, (B, L, C), dtype=jnp.float32)
    # Deterministic synthetic parameters (shapes match nn.Linear(C*pool, C*expand)).
    weight = jax.random.normal(kw, (C * expand, C * pool), dtype=jnp.float32) * 0.1
    bias = jax.random.normal(kb, (C * expand,), dtype=jnp.float32) * 0.1

    out = downsample(x, weight, bias, pool=pool)
    out = jax.block_until_ready(out)

    # Reference check in plain JAX (same math as the PyTorch forward).
    x_ref = x.reshape(B, L // pool, C * pool)
    ref = x_ref @ weight.T + bias
    assert out.shape == (B, L // pool, C * expand)
    assert jnp.allclose(out, ref, atol=1e-5, rtol=1e-5)

    print("KERNEL_OK")
</pallas_src>

<mosaic_0001>
module attributes {stable_mosaic.version = 11 : i64} {
  func.func @_proj_kernel(%arg0: i32, %arg1: memref<32x16xf32, #tpu.memory_space<vmem>>, %arg2: memref<16x8xf32, #tpu.memory_space<vmem>>, %arg3: memref<1x8xf32, #tpu.memory_space<vmem>>, %arg4: memref<32x8xf32, #tpu.memory_space<vmem>>) attributes {dimension_semantics = [#tpu.dimension_semantics<parallel>], iteration_bounds = array<i64: 1>, scalar_prefetch = 0 : i64, scratch_operands = 0 : i64, tpu.core_type = #tpu.core_type<tc>, window_params = [{transform_indices = @transform_0, window_bounds = array<i64: 32, 16>}, {pipeline_mode = #tpu.pipeline_mode<synchronous>, transform_indices = @transform_1, window_bounds = array<i64: 16, 8>}, {pipeline_mode = #tpu.pipeline_mode<synchronous>, transform_indices = @transform_2, window_bounds = array<i64: 1, 8>}, {transform_indices = @transform_3, window_bounds = array<i64: 32, 8>}]} {
    %c0 = arith.constant 0 : index
    %c0_0 = arith.constant 0 : index
    %0 = vector.load %arg1[%c0, %c0_0] : memref<32x16xf32, #tpu.memory_space<vmem>>, vector<32x16xf32>
    %c0_1 = arith.constant 0 : index
    %c0_2 = arith.constant 0 : index
    %1 = vector.load %arg2[%c0_1, %c0_2] : memref<16x8xf32, #tpu.memory_space<vmem>>, vector<16x8xf32>
    %cst = arith.constant dense<0.000000e+00> : vector<32x8xf32>
    %2 = tpu.matmul %0, %1, %cst {dimension_numbers = #tpu.dot_dimension_numbers<[1], [0], [0], [1], [0, 0, 1, 1], [], []>} : vector<32x16xf32>, vector<16x8xf32>, vector<32x8xf32> -> vector<32x8xf32>
    %c0_3 = arith.constant 0 : index
    %c0_4 = arith.constant 0 : index
    %3 = vector.load %arg3[%c0_3, %c0_4] : memref<1x8xf32, #tpu.memory_space<vmem>>, vector<1x8xf32>
    %4 = vector.broadcast %3 : vector<1x8xf32> to vector<32x8xf32>
    %5 = arith.addf %2, %4 : vector<32x8xf32>
    %c0_5 = arith.constant 0 : index
    %c0_6 = arith.constant 0 : index
    %6 = vector.load %arg4[%c0_5, %c0_6] : memref<32x8xf32, #tpu.memory_space<vmem>>, vector<32x8xf32>
    tpu.vector_store %arg4[%c0_5, %c0_6], %5 {strides = array<i32>} : memref<32x8xf32, #tpu.memory_space<vmem>>, vector<32x8xf32>,
    return
  }
  func.func @transform_0(%arg0: i32) -> (i32, i32) {
    %c0_i32 = arith.constant 0 : i32
    %c0_i32_0 = arith.constant 0 : i32
    return %arg0, %c0_i32 : i32, i32
  }
  func.func @transform_1(%arg0: i32) -> (i32, i32) {
    %c0_i32 = arith.constant 0 : i32
    %c0_i32_0 = arith.constant 0 : i32
    %c0_i32_1 = arith.constant 0 : i32
    return %c0_i32, %c0_i32_0 : i32, i32
  }
  func.func @transform_2(%arg0: i32) -> (i32, i32) {
    %c0_i32 = arith.constant 0 : i32
    %c0_i32_0 = arith.constant 0 : i32
    %c0_i32_1 = arith.constant 0 : i32
    return %c0_i32, %c0_i32_0 : i32, i32
  }
  func.func @transform_3(%arg0: i32) -> (i32, i32) {
    %c0_i32 = arith.constant 0 : i32
    %c0_i32_0 = arith.constant 0 : i32
    return %arg0, %c0_i32 : i32, i32
  }
}

</mosaic_0001>

<bundles_post_ra>
// kernel: tpu_custom_call.1
= control target key start
LH: loop header
LB: loop body
LE: loop exit
PB: predicated region body
PF: predicated region fallthrough
CT: control target
= control target key end

     0   :  { %vm27_vm0 = vcmask 130048   ;;  %vm125_vm1 = vcmask 64512   ;;  %s214_s1 = inlined_call_operand.vmem [shape: f32[16,8], index: 1, kind: input, shape index: {}]   ;;  %s215_s0 = inlined_call_operand.vmem [shape: f32[32,16], index: 0, kind: input, shape index: {}]   ;;  %s216_s2 = inlined_call_operand.vmem [shape: f32[1,8], index: 2, kind: input, shape index: {}]   ;;  %s217_s3 = inlined_call_operand.vmem [shape: f32[32,8], index: 3, kind: output, shape index: {}]  }
   0x1   :  { %v18_v0 = vld [vmem:[%s214_s1] sm:$0xff]  ;;  %v19_v1 = vld [vmem:[%s214_s1 + $0x8] sm:$0xff]  ;;  %v16_v4 = vld [vmem:[%s215_s0 + $0x10] sm:$0xff] }
   0x2   :  { %v14_v2 = vld [vmem:[%s215_s0] sm:$0xff]  ;;  %v155_v3 = vpack.c.bf16 %v19_v1, %v18_v0  ;;  %152 = vmatprep.mubr.msk.f32.mxu1 %vm27_vm0, %v16_v4  ;;  %v15_v5 = vld [vmem:[%s215_s0 + $0x8] sm:$0xff]  ;;  %v17_v6 = vld [vmem:[%s215_s0 + $0x18] sm:$0xff] }
   0x3   :  { %149 = vmatprep.mubr.msk.f32.mxu0 %vm27_vm0, %v14_v2  ;;  %v134_v7 = vld [vmem:[%s216_s2] ss:$0 sm:$0xff] }
   0x4   :  { %156 = vmatprep.subr.bf16.mxu0 %v155_v3  ;;  %159 = vmatprep.subr.bf16.mxu1 %v155_v3 }
   0x5   :  { %158 = vmatpush3.bf16.msra.mxu0 %v155_v3  ;;  %160 = vmatpush3.bf16.msra.mxu1 %v155_v3 }
   0x8   :  { %150 = vmatmul.mubr.msk.f32.vlgmr.msra.gmra.mrb[0].mxu0 %vm27_vm0, %v15_v5  ;;  %153 = vmatmul.mubr.msk.f32.vlgmr.msra.gmra.mrb[0].mxu1 %vm27_vm0, %v17_v6 }
  0xdb   :  { %v151_v8 = vpop.f32.mrb[0].mxu0  ;;  %v154_v9 = vpop.f32.mrb[0].mxu1 }
  0xdc   :  { %v112_v10 = vadd.f32 %v151_v8, %v134_v7  ;;  %v122_v11 = vadd.f32 %v154_v9, %v134_v7  ;;  %v106_v12 = vpop.f32.mrb[1].mxu0  ;;  %v116_v13 = vpop.f32.mrb[1].mxu1 }
  0xdd   :  { %v107_v14 = vadd.f32 %v134_v7, %v106_v12  ;;  %v117_v15 = vadd.f32 %v134_v7, %v116_v13 }
  0xde   :  { %127 = vst.msk [vmem:[%s217_s3 + $0x8] sm:$0xff] %vm125_vm1, %v112_v10  ;;  %129 = vst.msk [vmem:[%s217_s3 + $0x18] sm:$0xff] %vm125_vm1, %v122_v11 }
  0xdf   :  { %126 = vst.msk [vmem:[%s217_s3] sm:$0xff] %vm125_vm1, %v107_v14  ;;  %128 = vst.msk [vmem:[%s217_s3 + $0x10] sm:$0xff] %vm125_vm1, %v117_v15 }

</bundles_post_ra>
